<compile_context>
chip_gen: v5e
topology: v5e:2x2
jax: 0.10.0
libtpu: 0.0.40
codegen_flags: <defaults>
</compile_context>

<pallas_src>
import jax
import jax.numpy as jnp
from jax.experimental import pallas as pl
from jax.experimental.pallas import tpu as pltpu


def _copy_kernel(x_ref, o_ref):
    # Pass-through of the current (block_rows, lane) tile.
    o_ref[...] = x_ref[...]


def _vmem_capacity_bytes():
    """Best-effort query of per-core VMEM capacity (None if unavailable)."""
    try:
        info = pltpu.get_tpu_info()
        cap = getattr(info, "vmem_capacity_bytes", None)
        if cap:
            return int(cap)
    except Exception:
        pass
    return None


def _choose_layout(total: int, itemsize: int):
    """Pick (lane, rows, block_rows, vmem_limit_bytes) for a lane-dense copy.

    `total` is guaranteed to be a multiple of 128 by the caller.
    """
    # Lane width: largest multiple of 128 (from a fixed menu) dividing total.
    lane = 128
    for cand in (4096, 2048, 1024, 512, 256, 128):
        if total % cand == 0:
            lane = cand
            break
    rows = total // lane

    # Generation-aware tile sizing.
    vmem_cap = _vmem_capacity_bytes()
    if vmem_cap is not None and vmem_cap <= (64 << 20):
        # v7x-class: 64 MiB physical VMEM -> keep tiles <= 4 MiB,
        # (in+out) x double-buffer ~= 16 MiB resident under a 32 MiB limit.
        target_bytes = 4 << 20
        vmem_limit = 32 << 20
    elif vmem_cap is not None:
        # v5e / v6e: 128 MiB physical -> ~8 MiB tiles, 64 MiB scoped limit
        # (explicitly raised past v5e's 16 MiB default).
        target_bytes = 8 << 20
        vmem_limit = 64 << 20
    else:
        # Unknown chip: conservative defaults that are safe everywhere.
        target_bytes = 4 << 20
        vmem_limit = 32 << 20

    sub = max(8, 32 // max(1, itemsize))  # sublane granularity for this dtype
    row_bytes = lane * itemsize
    slab_bytes = rows * row_bytes

    if slab_bytes <= target_bytes:
        block_rows = rows
        # Megacore: split non-trivial single-tile slabs into >=2 grid steps so
        # both v7x TensorCores get work (harmless on single-core v5e/v6e).
        if rows > sub and slab_bytes > (512 << 10):
            half = (rows + 1) // 2
            block_rows = max(sub, ((half + sub - 1) // sub) * sub)
    else:
        # Fixed ~target-sized tile; the ragged last block is handled by the
        # pl.cdiv grid (Pallas masks out-of-bounds rows), so no divisor search.
        block_rows = max(sub, (target_bytes // row_bytes) // sub * sub)

    block_rows = min(block_rows, rows)
    return lane, rows, block_rows, vmem_limit


def _materialized_identity(img: jax.Array) -> jax.Array:
    """Efficient Pallas identity copy of `img` (lane-dense, cdiv-tiled)."""
    total = int(img.size)
    if total == 0:
        return img  # nothing to copy

    orig_dtype = img.dtype
    itemsize = img.dtype.itemsize

    flat = img.reshape(-1)
    pad = (-total) % 128

    used_bitcast = False
    if pad == 0 and itemsize < 4 and total % ((4 // itemsize) * 128) == 0:
        # Pack narrow dtypes into 32-bit words: halves/quarters in-kernel
        # vld/vst count (keeps the single vst slot on v5e/v6e off the
        # critical path).  Pure bit movement, exact round trip.
        ratio = 4 // itemsize
        flat = jax.lax.bitcast_convert_type(
            flat.reshape(total // ratio, ratio), jnp.int32)
        work_total = total // ratio
        work_itemsize = 4
        work_dtype = jnp.int32
        used_bitcast = True
    else:
        if pad:
            # Rare (total not a multiple of 128): pad the flat slab so the
            # kernel still sees a lane-dense 2-D view, then slice the tail off.
            flat = jnp.pad(flat, (0, pad))
        work_total = total + pad
        work_itemsize = itemsize
        work_dtype = orig_dtype

    lane, rows, block_rows, vmem_limit = _choose_layout(work_total,
                                                        work_itemsize)
    x2 = flat.reshape(rows, lane)
    grid = (pl.cdiv(rows, block_rows),)

    out = pl.pallas_call(
        _copy_kernel,
        out_shape=jax.ShapeDtypeStruct((rows, lane), work_dtype),
        grid=grid,
        in_specs=[pl.BlockSpec((block_rows, lane), lambda i: (i, 0))],
        out_specs=pl.BlockSpec((block_rows, lane), lambda i: (i, 0)),
        compiler_params=pltpu.CompilerParams(
            dimension_semantics=("parallel",),
            vmem_limit_bytes=vmem_limit),
    )(x2)

    out_flat = out.reshape(-1)
    if used_bitcast:
        out_flat = jax.lax.bitcast_convert_type(out_flat, orig_dtype)
        out_flat = out_flat.reshape(-1)
    elif pad:
        out_flat = out_flat[:total]
    return out_flat.reshape(img.shape)


def random_rotation_forward(img: jax.Array,
                            degrees=(-30.0, 30.0),
                            interpolation=None,
                            expand=False,
                            center=None,
                            fill=0,
                            resample=None,
                            materialize: bool = False) -> jax.Array:
    """Pallas implementation of RandomRotation.forward (identity on Tensors).

    Default is the true pass-through (returns `img` unchanged, zero HBM
    traffic).  `materialize=True` forces a fresh output buffer via an
    efficient Pallas copy kernel.
    """
    if not isinstance(img, jax.Array):
        raise TypeError("img should be PIL Image or Tensor")
    if not materialize:
        return img
    return _materialized_identity(img)


if __name__ == "__main__":
    key = jax.random.PRNGKey(0)
    degrees = (-30.0, 30.0)  # unused by the stub's forward

    x = jax.random.normal(key, (2, 4, 16, 16), dtype=jnp.float32)

    # Fast path: exact reference semantics, no kernel launch at all.
    y_fast = random_rotation_forward(x, degrees=degrees)
    assert y_fast is x

    # Kernel path: lane-dense tiled identity copy (exercises the Pallas kernel).
    y = random_rotation_forward(x, degrees=degrees, materialize=True)
    y = jax.block_until_ready(y)
    assert y.shape == x.shape and y.dtype == x.dtype
    assert bool(jnp.all(y == x))

    # bf16 path (int32 bitcast packing inside the wrapper).
    xb = jax.random.normal(key, (2, 4, 16, 16), dtype=jnp.bfloat16)
    yb = jax.block_until_ready(
        random_rotation_forward(xb, degrees=degrees, materialize=True))
    assert yb.shape == xb.shape and yb.dtype == xb.dtype
    assert bool(jnp.all(yb == xb))

    # Non-128-divisible element count (pad + slice path, no OOM fallback).
    xo = jax.random.normal(key, (3, 5, 7), dtype=jnp.float32)
    yo = jax.block_until_ready(
        random_rotation_forward(xo, degrees=degrees, materialize=True))
    assert yo.shape == xo.shape and bool(jnp.all(yo == xo))

    # Slab big enough to trigger the >=2 grid-step (megacore) split and the
    # ragged cdiv last block.
    xl = jax.random.normal(key, (2, 4, 192, 192), dtype=jnp.float32)
    yl = jax.block_until_ready(
        random_rotation_forward(xl, degrees=degrees, materialize=True))
    assert yl.shape == xl.shape and bool(jnp.all(yl == xl))

    print("KERNEL_OK")
</pallas_src>

<mosaic_0001>
module attributes {stable_mosaic.version = 11 : i64} {
  func.func @_copy_kernel(%arg0: i32, %arg1: memref<1x2048xf32, #tpu.memory_space<vmem>>, %arg2: memref<1x2048xf32, #tpu.memory_space<vmem>>) attributes {dimension_semantics = [#tpu.dimension_semantics<parallel>], iteration_bounds = array<i64: 1>, scalar_prefetch = 0 : i64, scratch_operands = 0 : i64, tpu.core_type = #tpu.core_type<tc>, window_params = [{transform_indices = @transform_0, window_bounds = array<i64: 1, 2048>}, {transform_indices = @transform_1, window_bounds = array<i64: 1, 2048>}]} {
    %c0 = arith.constant 0 : index
    %c0_0 = arith.constant 0 : index
    %0 = vector.load %arg1[%c0, %c0_0] : memref<1x2048xf32, #tpu.memory_space<vmem>>, vector<1x2048xf32>
    %c0_1 = arith.constant 0 : index
    %c0_2 = arith.constant 0 : index
    %1 = vector.load %arg2[%c0_1, %c0_2] : memref<1x2048xf32, #tpu.memory_space<vmem>>, vector<1x2048xf32>
    tpu.vector_store %arg2[%c0_1, %c0_2], %0 {strides = array<i32>} : memref<1x2048xf32, #tpu.memory_space<vmem>>, vector<1x2048xf32>,
    return
  }
  func.func @transform_0(%arg0: i32) -> (i32, i32) {
    %c0_i32 = arith.constant 0 : i32
    %c0_i32_0 = arith.constant 0 : i32
    return %arg0, %c0_i32 : i32, i32
  }
  func.func @transform_1(%arg0: i32) -> (i32, i32) {
    %c0_i32 = arith.constant 0 : i32
    %c0_i32_0 = arith.constant 0 : i32
    return %arg0, %c0_i32 : i32, i32
  }
}

</mosaic_0001>

<bundles_post_ra>
// kernel: tpu_custom_call.1
= control target key start
LH: loop header
LB: loop body
LE: loop exit
PB: predicated region body
PF: predicated region fallthrough
CT: control target
= control target key end

     0   :  { %6 = vsyncpa [#allocation3], 0  ;;  %s116_s0 = inlined_call_operand.hbm [shape: f32[1,2048], index: 0, kind: input, shape index: {}]   ;;  %s117_s1 = inlined_call_operand.hbm [shape: f32[1,2048], index: 1, kind: output, shape index: {}]  }
   0x1   :  { %7 = vsyncpa [#allocation4], 0  ;;  %s13_s8 = sshll.u32 %s116_s0, 4  ;;  %s98_s9 = smov [#allocation2]   ;;  %s14_s8 = int_to_ptr.hbm [resolvable:$true] %s13_s8 }
   0x2   :  { %s15_s10 = sshll.u32 %s98_s9, 4  ;;  %s16_s10 = int_to_ptr.vmem [resolvable:$true] %s15_s10 }
   0x3   :  { %18 = dma.hbm_to_vmem [thread:$0]  %s14_s8, 256, %s16_s10, [#allocation3]  }
   0x4   :  { %94 = dma.done.wait [#allocation3], 256  }
   0x5   :  { %95 = vsyncadd [#allocation3], 4294967040  ;;  %s99_s11 = smov [#allocation5]   ;;  %s34_s15 = sshll.u32 %s117_s1, 4  ;;  %v23_v0 = vld [vmem:[#allocation2] sm:$0xff]  ;;  %v24_v1 = vld [vmem:[#allocation2 + $0x8] sm:$0xff]  ;;  %s35_s15 = int_to_ptr.hbm [resolvable:$true] %s34_s15 }
   0x6   :  { %s32_s12 = sshll.u32 %s99_s11, 4  ;;  %25 = vst [vmem:[#allocation5] sm:$0xff] %v23_v0  ;;  %s33_s12 = int_to_ptr.vmem [resolvable:$true] %s32_s12 }
   0x7   :  { %26 = vst [vmem:[#allocation5 + $0x8] sm:$0xff] %v24_v1 }
   0x8   :  { %37 = dma.vmem_to_hbm [thread:$0]  %s33_s12, 256, %s35_s15, [#allocation4]  }
   0x9   :  { %96 = dma.done.wait [#allocation4], 256  }
   0xa   :  { %97 = vsyncadd [#allocation4], 4294967040 }
   0xb   :  { %42 = vsyncpa [#allocation3], 1 }
   0xc   :  { %43 = vsyncpa [#allocation4], 1 }

</bundles_post_ra>
